<compile_context>
chip_gen: v7x
topology: tpu7x:2x2x1
jax: 0.10.0
libtpu: 0.0.40
codegen_flags: <defaults>
</compile_context>

<pallas_src>
import functools

import jax
import jax.numpy as jnp
from jax.experimental import pallas as pl
from jax.experimental.pallas import tpu as pltpu


def _vmem_limit_bytes():
    """Generation-aware VMEM limit (96 MiB on 128-MiB parts, 48 MiB on v7x)."""
    try:
        cap = int(pltpu.get_tpu_info().vmem_capacity_bytes)
    except Exception:
        cap = 64 * 1024 * 1024  # conservative (v7x) fallback
    if cap >= 100 * 1024 * 1024:
        return 96 * 1024 * 1024
    return min(48 * 1024 * 1024, int(cap * 0.75))


def _choose_tile_n(n, c, itemsize, vmem_limit):
    """Row-tile size: multiple of 16, as big as the VMEM budget allows, but keeping
    >= 4 grid steps so both v7x TensorCores (and the pipeline) have work."""
    c_vmem = ((c + 127) // 128) * 128  # VMEM lane padding of the last dim
    per_row = (
        2 * c_vmem * itemsize      # double-buffered logits tile
        + 2 * 128 * 4              # double-buffered (tile_n, 1)->(tile_n, 128) targets
        + 5 * c_vmem * 4           # in-kernel full-tile f32 temporaries
    )
    budget = int(vmem_limit * 0.75)
    tn = budget // per_row
    tn = max(16, min(8192, (tn // 16) * 16))
    # Keep >= 4 grid steps when N allows it (megacore / pipeline depth).
    tn_parallel = max(16, ((pl.cdiv(n, 4) + 15) // 16) * 16)
    tn = min(tn, tn_parallel)
    n_up = ((n + 15) // 16) * 16
    return min(tn, n_up)


def _focal_loss_kernel(x_ref, t_ref, a_ref, out_ref, *, gamma, tile_n, n_valid):
    i = pl.program_id(0)

    x = x_ref[...].astype(jnp.float32)          # (TN, C)  logits
    t = t_ref[...]                              # (TN, 1)  int32 target ids
    alpha = a_ref[...].astype(jnp.float32)      # (1, C)   per-class alpha

    # log-softmax of the target class only (no full softmax divide, no p_all temp)
    m = jnp.max(x, axis=1, keepdims=True)                        # (TN, 1)
    xm = x - m
    lse = jnp.log(jnp.sum(jnp.exp(xm), axis=1, keepdims=True))   # (TN, 1)

    col = jax.lax.broadcasted_iota(jnp.int32, x.shape, 1)
    is_t = col == t                                              # one-hot (bool)

    x_t = jnp.sum(jnp.where(is_t, xm, 0.0), axis=1, keepdims=True)      # logit[t] - m
    alpha_t = jnp.sum(jnp.where(is_t, alpha, 0.0), axis=1, keepdims=True)

    log_p = x_t - lse                                            # log softmax[target]
    probs = jnp.exp(log_p)

    # (1 - p)^gamma: integer gamma -> VPU multiply chain (no exp/log pow, no NaN at p==1)
    q = 1.0 - probs
    g = float(gamma)
    if g.is_integer() and g >= 0:
        e = int(g)
        w = jnp.ones_like(q)
        base = q
        while e > 0:                      # unrolled at trace time (gamma is static)
            if e & 1:
                w = w * base
            e >>= 1
            if e:
                base = base * base
    else:
        w = jnp.power(q, g)

    batch_loss = -alpha_t * w * log_p                             # (TN, 1)

    # Mask out rows past N (ragged last tile reads undefined data; all ops above are
    # per-row, so any garbage/NaN there is confined to these rows and zeroed here).
    row = i * tile_n + jax.lax.broadcasted_iota(jnp.int32, batch_loss.shape, 0)
    batch_loss = jnp.where(row < n_valid, batch_loss, 0.0)

    partial = jnp.sum(batch_loss)

    # lane-dense (8, 128) output block: partial at [0, 0], zeros elsewhere
    rid = jax.lax.broadcasted_iota(jnp.int32, (8, 128), 0)
    cid = jax.lax.broadcasted_iota(jnp.int32, (8, 128), 1)
    out_ref[...] = jnp.where((rid == 0) & (cid == 0), partial, 0.0)


def focal_loss(inputs, targets, alpha=None, gamma=6, size_average=True, tile_n=None):
    """Pallas equivalent of FocalLoss.forward.

    inputs:  (N, C) float logits (f32 or bf16)
    targets: (N,)   int class indices
    alpha:   optional (C,) or (C,1) per-class weights (default: ones, as in the module)
    """
    inputs = jnp.asarray(inputs)
    if not jnp.issubdtype(inputs.dtype, jnp.floating):
        inputs = inputs.astype(jnp.float32)
    N, C = inputs.shape

    if alpha is None:
        alpha_arr = jnp.ones((1, C), dtype=jnp.float32)
    else:
        alpha_arr = jnp.asarray(alpha, jnp.float32).reshape(-1)[:C].reshape(1, C)

    t = jnp.asarray(targets, jnp.int32).reshape(N, 1)

    itemsize = jnp.dtype(inputs.dtype).itemsize
    vmem_limit = _vmem_limit_bytes()
    if tile_n is None:
        tile_n = _choose_tile_n(N, C, itemsize, vmem_limit)
    n_tiles = pl.cdiv(N, tile_n)

    cost = pl.CostEstimate(
        flops=int(6 * N * C),
        transcendentals=int(N * C + 3 * N),
        bytes_accessed=int(N * C * itemsize + N * 4 + C * 4 + n_tiles * 8 * 128 * 4),
    )

    kernel = functools.partial(
        _focal_loss_kernel, gamma=float(gamma), tile_n=tile_n, n_valid=N
    )

    partials = pl.pallas_call(
        kernel,
        out_shape=jax.ShapeDtypeStruct((8, n_tiles * 128), jnp.float32),
        grid=(n_tiles,),
        in_specs=[
            pl.BlockSpec((tile_n, C), lambda i: (i, 0)),   # raw logits tile (no pad)
            pl.BlockSpec((tile_n, 1), lambda i: (i, 0)),   # targets tile
            pl.BlockSpec((1, C), lambda i: (0, 0)),        # alpha (replicated)
        ],
        out_specs=pl.BlockSpec((8, 128), lambda i: (0, i)),    # per-tile partial sums
        compiler_params=pltpu.CompilerParams(
            dimension_semantics=("parallel",),
            vmem_limit_bytes=vmem_limit,
        ),
        cost_estimate=cost,
    )(inputs, t, alpha_arr)

    total = jnp.sum(partials)
    if size_average:
        total = total / jnp.float32(N)
    return total


def _focal_loss_ref(inputs, targets, alpha=None, gamma=6, size_average=True):
    """Pure-JAX reference mirroring the PyTorch module."""
    N, C = inputs.shape
    if alpha is None:
        alpha = jnp.ones((C,), dtype=jnp.float32)
    alpha = jnp.asarray(alpha, jnp.float32).reshape(-1)
    log_p_all = jax.nn.log_softmax(inputs.astype(jnp.float32), axis=1)
    log_pt = jnp.take_along_axis(log_p_all, targets.reshape(-1, 1), axis=1)[:, 0]
    pt = jnp.exp(log_pt)
    at = alpha[targets]
    batch = -at * jnp.power(1.0 - pt, float(gamma)) * log_pt
    return jnp.mean(batch) if size_average else jnp.sum(batch)


if __name__ == "__main__":
    key = jax.random.PRNGKey(0)
    k_x, k_t, k_a = jax.random.split(key, 3)

    # Case 1: defaults (gamma=6, alpha=ones, mean), shapes matching the module's 2-D use.
    N, C = 16, 8
    inputs = jax.random.normal(k_x, (N, C), dtype=jnp.float32)
    targets = jax.random.randint(k_t, (N,), 0, C, dtype=jnp.int32)
    loss = jax.block_until_ready(focal_loss(inputs, targets, gamma=6, size_average=True))
    ref = _focal_loss_ref(inputs, targets, gamma=6, size_average=True)
    assert jnp.allclose(loss, ref, rtol=1e-4, atol=1e-6), (loss, ref)

    # Case 2: custom alpha, sum reduction, narrow C (=5), ragged last row-tile.
    N2, C2 = 37, 5
    x2 = jax.random.normal(k_a, (N2, C2), dtype=jnp.float32) * 3.0
    t2 = jax.random.randint(k_t, (N2,), 0, C2, dtype=jnp.int32)
    a2 = jnp.arange(1, C2 + 1, dtype=jnp.float32) / C2
    l2 = jax.block_until_ready(focal_loss(x2, t2, alpha=a2, gamma=2, size_average=False))
    r2 = _focal_loss_ref(x2, t2, alpha=a2, gamma=2, size_average=False)
    assert jnp.allclose(l2, r2, rtol=1e-4, atol=1e-6), (l2, r2)

    # Case 3: forced small tile -> multi-tile grid + ragged last tile.
    N3, C3 = 100, 12
    x3 = jax.random.normal(k_x, (N3, C3), dtype=jnp.float32)
    t3 = jax.random.randint(k_a, (N3,), 0, C3, dtype=jnp.int32)
    l3 = jax.block_until_ready(focal_loss(x3, t3, gamma=6, size_average=True, tile_n=16))
    r3 = _focal_loss_ref(x3, t3, gamma=6, size_average=True)
    assert jnp.allclose(l3, r3, rtol=1e-4, atol=1e-6), (l3, r3)

    # Case 4: auto tiling with >=4 grid steps and a ragged final tile (N=300, C=10).
    N4, C4 = 300, 10
    x4 = jax.random.normal(k_t, (N4, C4), dtype=jnp.float32)
    t4 = jax.random.randint(k_x, (N4,), 0, C4, dtype=jnp.int32)
    l4 = jax.block_until_ready(focal_loss(x4, t4, gamma=6, size_average=True))
    r4 = _focal_loss_ref(x4, t4, gamma=6, size_average=True)
    assert jnp.allclose(l4, r4, rtol=1e-4, atol=1e-6), (l4, r4)

    print("KERNEL_OK")
</pallas_src>

<mosaic_0001>
module attributes {stable_mosaic.version = 11 : i64} {
  func.func @_focal_loss_kernel(%arg0: i32, %arg1: memref<16x8xf32, #tpu.memory_space<vmem>>, %arg2: memref<16x1xi32, #tpu.memory_space<vmem>>, %arg3: memref<1x8xf32, #tpu.memory_space<vmem>>, %arg4: memref<8x128xf32, #tpu.memory_space<vmem>>) attributes {dimension_semantics = [#tpu.dimension_semantics<parallel>], iteration_bounds = array<i64: 1>, scalar_prefetch = 0 : i64, scratch_operands = 0 : i64, tpu.core_type = #tpu.core_type<tc>, window_params = [{transform_indices = @transform_0, window_bounds = array<i64: 16, 8>}, {transform_indices = @transform_1, window_bounds = array<i64: 16, 1>}, {pipeline_mode = #tpu.pipeline_mode<synchronous>, transform_indices = @transform_2, window_bounds = array<i64: 1, 8>}, {transform_indices = @transform_3, window_bounds = array<i64: 8, 128>}]} {
    %c0 = arith.constant 0 : index
    %c0_0 = arith.constant 0 : index
    %0 = vector.load %arg1[%c0, %c0_0] : memref<16x8xf32, #tpu.memory_space<vmem>>, vector<16x8xf32>
    %c0_1 = arith.constant 0 : index
    %c0_2 = arith.constant 0 : index
    %1 = vector.load %arg2[%c0_1, %c0_2] : memref<16x1xi32, #tpu.memory_space<vmem>>, vector<16x1xi32>
    %c0_3 = arith.constant 0 : index
    %c0_4 = arith.constant 0 : index
    %2 = vector.load %arg3[%c0_3, %c0_4] : memref<1x8xf32, #tpu.memory_space<vmem>>, vector<1x8xf32>
    %cst = arith.constant dense<0xFF800000> : vector<16xf32>
    %3 = vector.multi_reduction <maximumf>, %0, %cst [1] : vector<16x8xf32> to vector<16xf32>
    %4 = vector.shape_cast %3 : vector<16xf32> to vector<16x1xf32>
    %5 = vector.broadcast %4 : vector<16x1xf32> to vector<16x8xf32>
    %6 = arith.subf %0, %5 : vector<16x8xf32>
    %7 = math.exp %6 : vector<16x8xf32>
    %cst_5 = arith.constant dense<0.000000e+00> : vector<16xf32>
    %8 = vector.multi_reduction <add>, %7, %cst_5 [1] : vector<16x8xf32> to vector<16xf32>
    %9 = vector.shape_cast %8 : vector<16xf32> to vector<16x1xf32>
    %10 = math.log %9 : vector<16x1xf32>
    %11 = tpu.iota {dimensions = array<i32: 1>} : vector<16x8xi32>
    %12 = vector.broadcast %1 : vector<16x1xi32> to vector<16x8xi32>
    %13 = arith.cmpi eq, %11, %12 : vector<16x8xi32>
    %cst_6 = arith.constant 0.000000e+00 : f32
    %14 = vector.broadcast %cst_6 : f32 to vector<16x8xf32>
    %15 = arith.select %13, %6, %14 : vector<16x8xi1>, vector<16x8xf32>
    %cst_7 = arith.constant dense<0.000000e+00> : vector<16xf32>
    %16 = vector.multi_reduction <add>, %15, %cst_7 [1] : vector<16x8xf32> to vector<16xf32>
    %17 = vector.shape_cast %16 : vector<16xf32> to vector<16x1xf32>
    %cst_8 = arith.constant 0.000000e+00 : f32
    %18 = vector.shape_cast %2 : vector<1x8xf32> to vector<1x8xf32>
    %19 = vector.broadcast %18 : vector<1x8xf32> to vector<16x8xf32>
    %20 = vector.broadcast %cst_8 : f32 to vector<16x8xf32>
    %21 = arith.select %13, %19, %20 : vector<16x8xi1>, vector<16x8xf32>
    %cst_9 = arith.constant dense<0.000000e+00> : vector<16xf32>
    %22 = vector.multi_reduction <add>, %21, %cst_9 [1] : vector<16x8xf32> to vector<16xf32>
    %23 = vector.shape_cast %22 : vector<16xf32> to vector<16x1xf32>
    %24 = arith.subf %17, %10 : vector<16x1xf32>
    %25 = math.exp %24 : vector<16x1xf32>
    %cst_10 = arith.constant 1.000000e+00 : f32
    %26 = vector.broadcast %cst_10 : f32 to vector<16x1xf32>
    %27 = arith.subf %26, %25 : vector<16x1xf32>
    %cst_11 = arith.constant 1.000000e+00 : f32
    %28 = vector.broadcast %cst_11 : f32 to vector<16x1xf32>
    %29 = arith.mulf %27, %27 : vector<16x1xf32>
    %30 = arith.mulf %28, %29 : vector<16x1xf32>
    %31 = arith.mulf %29, %29 : vector<16x1xf32>
    %32 = arith.mulf %30, %31 : vector<16x1xf32>
    %cst_12 = arith.constant 0.000000e+00 : f32
    %33 = vector.broadcast %cst_12 : f32 to vector<16x1xf32>
    %34 = arith.subf %33, %23 : vector<16x1xf32>
    %35 = arith.mulf %34, %32 : vector<16x1xf32>
    %36 = arith.mulf %35, %24 : vector<16x1xf32>
    %c16_i32 = arith.constant 16 : i32
    %37 = arith.muli %arg0, %c16_i32 : i32
    %38 = tpu.iota {dimensions = array<i32: 0>} : vector<16x1xi32>
    %39 = vector.broadcast %37 : i32 to vector<16x1xi32>
    %40 = arith.addi %39, %38 : vector<16x1xi32>
    %c16_i32_13 = arith.constant 16 : i32
    %41 = vector.broadcast %c16_i32_13 : i32 to vector<16x1xi32>
    %42 = arith.cmpi slt, %40, %41 : vector<16x1xi32>
    %cst_14 = arith.constant 0.000000e+00 : f32
    %43 = vector.broadcast %cst_14 : f32 to vector<16x1xf32>
    %44 = arith.select %42, %36, %43 : vector<16x1xi1>, vector<16x1xf32>
    %45 = vector.shape_cast %44 : vector<16x1xf32> to vector<1x16x1xf32>
    %cst_15 = arith.constant dense<0.000000e+00> : vector<1xf32>
    %46 = vector.multi_reduction <add>, %45, %cst_15 [1, 2] : vector<1x16x1xf32> to vector<1xf32>
    %47 = vector.shape_cast %46 : vector<1xf32> to vector<1x1x1xf32>
    %48 = vector.extract %47[0, 0, 0] : f32 from vector<1x1x1xf32>
    %49 = tpu.iota {dimensions = array<i32: 0>} : vector<8x128xi32>
    %50 = tpu.iota {dimensions = array<i32: 1>} : vector<8x128xi32>
    %c0_i32 = arith.constant 0 : i32
    %51 = vector.broadcast %c0_i32 : i32 to vector<8x128xi32>
    %52 = arith.cmpi eq, %49, %51 : vector<8x128xi32>
    %c0_i32_16 = arith.constant 0 : i32
    %53 = vector.broadcast %c0_i32_16 : i32 to vector<8x128xi32>
    %54 = arith.cmpi eq, %50, %53 : vector<8x128xi32>
    %55 = arith.andi %52, %54 : vector<8x128xi1>
    %cst_17 = arith.constant 0.000000e+00 : f32
    %56 = vector.broadcast %48 : f32 to vector<8x128xf32>
    %57 = vector.broadcast %cst_17 : f32 to vector<8x128xf32>
    %58 = arith.select %55, %56, %57 : vector<8x128xi1>, vector<8x128xf32>
    %c0_18 = arith.constant 0 : index
    %c0_19 = arith.constant 0 : index
    %59 = vector.load %arg4[%c0_18, %c0_19] : memref<8x128xf32, #tpu.memory_space<vmem>>, vector<8x128xf32>
    tpu.vector_store %arg4[%c0_18, %c0_19], %58 {strides = array<i32>} : memref<8x128xf32, #tpu.memory_space<vmem>>, vector<8x128xf32>,
    return
  }
  func.func @transform_0(%arg0: i32) -> (i32, i32) {
    %c0_i32 = arith.constant 0 : i32
    %c0_i32_0 = arith.constant 0 : i32
    return %arg0, %c0_i32 : i32, i32
  }
  func.func @transform_1(%arg0: i32) -> (i32, i32) {
    %c0_i32 = arith.constant 0 : i32
    %c0_i32_0 = arith.constant 0 : i32
    return %arg0, %c0_i32 : i32, i32
  }
  func.func @transform_2(%arg0: i32) -> (i32, i32) {
    %c0_i32 = arith.constant 0 : i32
    %c0_i32_0 = arith.constant 0 : i32
    %c0_i32_1 = arith.constant 0 : i32
    return %c0_i32, %c0_i32_0 : i32, i32
  }
  func.func @transform_3(%arg0: i32) -> (i32, i32) {
    %c0_i32 = arith.constant 0 : i32
    %c0_i32_0 = arith.constant 0 : i32
    return %c0_i32, %arg0 : i32, i32
  }
}

</mosaic_0001>

<bundles_post_ra>
// kernel: tpu_custom_call.1
= control target key start
LH: loop header
LB: loop body
LE: loop exit
PB: predicated region body
PF: predicated region fallthrough
CT: control target
= control target key end

     0   :  { %vm20_vm0 = vcmask 64512   ;;  %v182_v4 = vmov 0   ;;  %s246_s0 = inlined_call_operand.vmem [shape: f32[16,8], index: 0, kind: input, shape index: {}]   ;;  %s247_s1 = inlined_call_operand.vmem [shape: s32[16,1], index: 1, kind: input, shape index: {}]   ;;  %s248_s2 = inlined_call_operand.vmem [shape: f32[1,8], index: 2, kind: input, shape index: {}]   ;;  %s249_s3 = inlined_call_operand.hbm [shape: f32[8,128], index: 3, kind: output, shape index: {}]  }
   0x1   :  { %v15_v0 = vld [vmem:[%s246_s0] sm:$0xff]  ;;  %v16_v1 = vld [vmem:[%s246_s0 + $0x8] sm:$0xff]  ;;  %144 = vset.pattern.permute.xlu1 %v182_v4  ;;  %145 = vset.pattern.permute.xlu0 %v182_v4 }
   0x2   :  { %v17_v2 = vld [vmem:[%s247_s1] sm:$0xff]  ;;  %v21_v3 = vsel %vm20_vm0, %v15_v0, -inf }
   0x3   :  { %8 = vsyncpa [#allocation3], 0  ;;  %22 = vmax.xlane.f32.xlu0 %v21_v3  ;;  %46 = vperm.xlu1 %144, %v17_v2   ;;  %v24_v5 = vsel %vm20_vm0, %v16_v1, -inf  ;;  %v18_v6 = vld [vmem:[%s247_s1 + $0x8] sm:$0xff]  ;;  %v43_v12 = vlaneseq  ;;  %v139_v23 = vld [vmem:[%s248_s2] ss:$0 sm:$0xff] }
   0x4   :  { %vm106_vm3 = vcmask 7168   ;;  %s183_s2 = smov [#allocation2]  }
   0x5   :  { %v219_v15 = vand.u32 127, %v43_v12  ;;  %s131_s20 = sshll.u32 %s183_s2, 4  ;;  %s132_s20 = int_to_ptr.vmem [resolvable:$true] %s131_s20 }
   0x6   :  { %s158_s22 = scalar_lea.vmem %s132_s20, 128  ;;  %p163_p1 = scmp.lt.s32.totalorder %s132_s20, %s132_s20 }
   0x7   :  { %25 = vmax.xlane.f32.xlu0 %v24_v5  ;;  %49 = vperm.xlu1 %144, %v18_v6   ;;  %v97_v6 = vshrl.u32 %v43_v12, 7  ;;  %vm120_vm5 = vcmp.eq.s32.totalorder %v219_v15, 0  ;;  %p159_p0 = scmp.ne.s32.totalorder %s132_s20, %s158_s22  ;;  %p164_p2 = scmp.lt.s32.totalorder %s158_s22, %s158_s22 }
   0x9   :  { %vm119_vm4 = vcmp.eq.s32.totalorder %v97_v6, 0  ;;  %p165_p3 = por %p164_p2, %p163_p1 }
   0xa   :  { %vm121_vm6 = vmand %vm119_vm4, %vm120_vm5 }
   0xb   :  { %p166_p4 = pnand %p165_p3, %p159_p0 }
  0x82   :  { %v47_v14 = vpop.permute.xlu1 %46 }
  0x83   :  { %vm51_vm1 = vcmp.eq.s32.totalorder %v219_v15, %v47_v14 }
  0x84   :  { %v67_v25 = vsel %vm51_vm1, %v139_v23, 0.0 }
  0x85   :  { %v69_v27 = vsel %vm20_vm0, %v67_v25, 0.0 }
  0x86   :  { %v50_v17 = vpop.permute.xlu1 %49 }
  0x87   :  { %vm52_vm2 = vcmp.eq.s32.totalorder %v219_v15, %v50_v17 }
  0x88   :  { %v68_v28 = vsel %vm52_vm2, %v139_v23, 0.0 }
  0x89   :  { %v72_v29 = vsel %vm20_vm0, %v68_v28, 0.0 }
  0x90   :  { %v23_v7 = vpop.xlane.xlu0 %22 }
  0x91   :  { %v27_v8 = vsub.f32 %v15_v0, %v23_v7 }
  0x93   :  { %v29_v9 = vmul.f32 1.442695, %v27_v8  ;;  %v53_v19 = vsel %vm51_vm1, %v27_v8, 0.0 }
  0x94   :  { %v26_v10 = vpop.xlane.xlu0 %25  ;;  %v55_v21 = vsel %vm20_vm0, %v53_v19, 0.0 }
  0x95   :  { %146 = vpow2.f32 %v29_v9  ;;  %v28_v11 = vsub.f32 %v16_v1, %v26_v10 }
  0x97   :  { %v31_v13 = vmul.f32 1.442695, %v28_v11  ;;  %v54_v24 = vsel %vm52_vm2, %v28_v11, 0.0 }
  0x98   :  { %v58_v26 = vsel %vm20_vm0, %v54_v24, 0.0 }
  0x99   :  { %148 = vpow2.f32 %v31_v13 }
  0x9f   :  { %v147_v16 = vpop.eup %146 }
  0xa0   :  { %v33_v18 = vsel %vm20_vm0, %v147_v16, 0.0 }
  0xa1   :  { %34 = vadd.xlane.f32.xlu0 %v33_v18 }
  0xa3   :  { %v149_v20 = vpop.eup %148 }
  0xa4   :  { %v36_v22 = vsel %vm20_vm0, %v149_v20, 0.0 }
  0xa5   :  { %56 = vadd.xlane.f32.xlu0 %v55_v21  ;;  %37 = vadd.xlane.f32.xlu1 %v36_v22 }
  0xa9   :  { %59 = vadd.xlane.f32.xlu0 %v58_v26 }
  0xad   :  { %70 = vadd.xlane.f32.xlu0 %v69_v27 }
  0xb1   :  { %73 = vadd.xlane.f32.xlu0 %v72_v29 }
 0x12e   :  { %v35_v30 = vpop.xlane.xlu0 %34 }
 0x12f   :  { %150 = vlog2.f32 %v35_v30 }
 0x132   :  { %v38_v31 = vpop.xlane.xlu1 %37  ;;  %v57_v33 = vpop.xlane.xlu0 %56 }
 0x133   :  { %152 = vlog2.f32 %v38_v31 }
 0x136   :  { %v60_v39 = vpop.xlane.xlu0 %59 }
 0x139   :  { %v151_v32 = vpop.eup %150 }
 0x13a   :  { %v40_v34 = vmul.f32 0.6931472, %v151_v32  ;;  %v71_v44 = vpop.xlane.xlu0 %70 }
 0x13b   :  { %v89_v51 = vsub.f32 0.0, %v71_v44 }
 0x13c   :  { %v75_v35 = vsub.f32 %v57_v33, %v40_v34 }
 0x13d   :  { %v153_v36 = vpop.eup %152 }
 0x13e   :  { %v77_v37 = vmul.f32 1.442695, %v75_v35  ;;  %v42_v38 = vmul.f32 0.6931472, %v153_v36  ;;  %v74_v52 = vpop.xlane.xlu0 %73 }
 0x13f   :  { %v90_v56 = vsub.f32 0.0, %v74_v52 }
 0x140   :  { %154 = vpow2.f32 %v77_v37  ;;  %v76_v40 = vsub.f32 %v60_v39, %v42_v38 }
 0x142   :  { %v79_v41 = vmul.f32 1.442695, %v76_v40 }
 0x144   :  { %156 = vpow2.f32 %v79_v41 }
 0x14a   :  { %v155_v42 = vpop.eup %154 }
 0x14b   :  { %v81_v43 = vsub.f32 1.0, %v155_v42 }
 0x14d   :  { %v83_v45 = vmul.f32 %v81_v43, %v81_v43 }
 0x14e   :  { %v157_v46 = vpop.eup %156 }
 0x14f   :  { %v82_v47 = vsub.f32 1.0, %v157_v46  ;;  %v85_v48 = vmul.f32 %v83_v45, %v83_v45 }
 0x151   :  { %v84_v49 = vmul.f32 %v82_v47, %v82_v47  ;;  %v87_v50 = vmul.f32 %v85_v48, %v83_v45 }
 0x153   :  { %v91_v53 = vmul.f32 %v89_v51, %v87_v50  ;;  %v86_v54 = vmul.f32 %v84_v49, %v84_v49 }
 0x155   :  { %v88_v55 = vmul.f32 %v86_v54, %v84_v49  ;;  %v93_v58 = vmul.f32 %v91_v53, %v75_v35 }
 0x157   :  { %v92_v57 = vmul.f32 %v90_v56, %v88_v55  ;;  %v107_v60 = vsel %vm106_vm3, %v93_v58, 0.0 }
 0x159   :  { %v94_v59 = vmul.f32 %v92_v57, %v76_v40 }
 0x15b   :  { %v108_v61 = vsel %vm106_vm3, %v94_v59, 0.0 }
 0x15c   :  { %v109_v62 = vadd.f32 %v108_v61, %v107_v60 }
 0x15e   :  { %110 = vadd.xlane.f32.xlu0 %v109_v62 }
 0x1eb   :  { %v111_v63 = vpop.xlane.xlu0 %110 }
 0x1ec   :  { %v112_v0 = vrot.slane %v111_v63, 4 }
 0x1ee   :  { %v113_v1 = vadd.f32 %v112_v0, %v111_v63 }
 0x1f0   :  { %v114_v2 = vrot.slane %v113_v1, 2 }
 0x1f2   :  { %v115_v3 = vadd.f32 %v114_v2, %v113_v1 }
 0x1f4   :  { %v116_v4 = vrot.slane %v115_v3, 1 }
 0x1f6   :  { %v117_v5 = vadd.f32 %v116_v4, %v115_v3 }
 0x1f8   :  { %140 = vpush %v117_v5 }
 0x229   :  { %s141_s21 = spop %140 }
 0x22a   :  { %v122_v7 = vstv %s141_s21 }
 0x22b   :  { %v123_v8 = vsel %vm121_vm6, %v122_v7, 0.0 }
 0x22c   :  { %124 = vst [vmem:[#allocation2] sm:$0xff] %v123_v8 }
 0x22d   :  { %169 = shalt.err (!%p166_p4)
}
 0x22e   :  { %s170_s25 = scalar_lea.hbm %s249_s3, 128 }
 0x22f   :  { %p171_p5 = scmp.ne.s32.totalorder %s249_s3, %s170_s25  ;;  %p174_p6 = scmp.lt.u32.totalorder %s170_s25, %s249_s3 }
 0x231   :  { %p176_p7 = pnand %p174_p6, %p171_p5 }
 0x233   :  { %179 = shalt.err (!%p176_p7)
}
 0x234   :  { %134 = dma.vmem_to_hbm [thread:$0]  %s132_s20, 128, %s249_s3, [#allocation3]  }
 0x235   :  { %180 = dma.done.wait [#allocation3], 128  }
 0x236   :  { %181 = vsyncadd [#allocation3], 4294967168 }
 0x237   :  { %138 = vsyncpa [#allocation3], 1 }

</bundles_post_ra>
